<compile_context>
chip_gen: v6e
topology: v6e:2x2x1
jax: 0.10.0
libtpu: 0.0.40
codegen_flags: <defaults>
</compile_context>

<pallas_src>
import functools

import jax
import jax.numpy as jnp
from jax.experimental import pallas as pl
from jax.experimental.pallas import tpu as pltpu


def _round_up(n, m):
    return ((n + m - 1) // m) * m


def _vmem_limit_bytes():
    # v7x has only 64 MiB VMEM per TensorCore -> stay at 48 MiB there.
    # v5e/v6e have 128 MiB physical (scoped defaults 16/32 MiB) -> 64 MiB headroom.
    limit = 48 * 1024 * 1024
    try:
        if pltpu.get_tpu_info().vmem_capacity_bytes >= 128 * 1024 * 1024:
            limit = 64 * 1024 * 1024
    except Exception:
        pass
    return limit


def _choose_tile_b(batch, tile_b):
    """Batch tile: multiple of 16 (bf16 sublane packing), capped by the batch,
    and kept small enough that big batches still produce >=2 grid steps so
    v7x's two TensorCores both get work."""
    b16 = _round_up(max(batch, 1), 16)
    tb = min(_round_up(tile_b, 16), b16)
    if b16 >= 32:
        tb = min(tb, _round_up(-(-b16 // 2), 16))
    return max(tb, 16)


def _qnet_kernel(x_ref, w1_ref, b1_ref, w2_ref, b2_ref, q_ref):
    # hidden = relu(x @ W1 + b1): bf16 MXU matmul, f32 accumulation, f32 VPU epilogue.
    h = jnp.dot(x_ref[...], w1_ref[...], preferred_element_type=jnp.float32)
    h = jnp.maximum(h + b1_ref[...], 0.0)
    # q = hidden @ W2 + b2
    q = jnp.dot(h.astype(jnp.bfloat16), w2_ref[...], preferred_element_type=jnp.float32)
    q_ref[...] = (q + b2_ref[...]).astype(q_ref.dtype)


def prepare_qnetwork_params(w1, b1, w2, b2):
    """Pad weight dims to multiples of 128 and pre-cast MXU operands to bf16.

    Done ONCE (outside the per-step forward) so repeated forward calls do not
    re-read, re-pad and re-cast the weights from HBM every step.
    Zero padding is inert: padded bias entries are 0 and padded weight rows/cols
    are 0, so the un-padded outputs are unchanged.
    """
    S, F = w1.shape
    A = w2.shape[1]
    S_p, F_p, A_p = _round_up(S, 128), _round_up(F, 128), _round_up(A, 128)
    w1_p = jnp.zeros((S_p, F_p), jnp.bfloat16).at[:S, :F].set(w1.astype(jnp.bfloat16))
    b1_p = jnp.zeros((1, F_p), jnp.float32).at[:, :F].set(
        jnp.reshape(b1, (1, F)).astype(jnp.float32))
    w2_p = jnp.zeros((F_p, A_p), jnp.bfloat16).at[:F, :A].set(w2.astype(jnp.bfloat16))
    b2_p = jnp.zeros((1, A_p), jnp.float32).at[:, :A].set(
        jnp.reshape(b2, (1, A)).astype(jnp.float32))
    return (w1_p, b1_p, w2_p, b2_p)


@functools.partial(
    jax.jit,
    static_argnames=("action_size", "tile_b", "out_dtype", "single_buffer_weights"),
)
def _forward_impl(x, w1_p, b1_p, w2_p, b2_p, *, action_size, tile_b, out_dtype,
                  single_buffer_weights):
    B, S = x.shape
    S_p, F_p = w1_p.shape
    A_p = w2_p.shape[1]

    tile_b = _choose_tile_b(B, tile_b)
    B_p = _round_up(B, tile_b)

    # Pad + cast the activation stream in one fused op: bf16 halves the streamed
    # HBM->VMEM bytes for the x tiles and removes the per-tile in-kernel cast.
    x_p = jnp.zeros((B_p, S_p), jnp.bfloat16).at[:B, :S].set(x.astype(jnp.bfloat16))

    resident_kwargs = {}
    if single_buffer_weights:
        # Grid-invariant operands: single-buffer to halve their VMEM footprint
        # (matters most on v7x's 64 MiB VMEM as feature_size grows).
        resident_kwargs = dict(pipeline_mode=pl.Buffered(1))

    grid = (B_p // tile_b,)

    q_p = pl.pallas_call(
        _qnet_kernel,
        out_shape=jax.ShapeDtypeStruct((B_p, A_p), out_dtype),
        grid_spec=pltpu.PrefetchScalarGridSpec(
            num_scalar_prefetch=0,
            grid=grid,
            in_specs=[
                pl.BlockSpec((tile_b, S_p), lambda i: (i, 0)),                    # x tile (pipelined)
                pl.BlockSpec((S_p, F_p), lambda i: (0, 0), **resident_kwargs),    # W1 resident
                pl.BlockSpec((1, F_p), lambda i: (0, 0), **resident_kwargs),      # b1 resident
                pl.BlockSpec((F_p, A_p), lambda i: (0, 0), **resident_kwargs),    # W2 resident
                pl.BlockSpec((1, A_p), lambda i: (0, 0), **resident_kwargs),      # b2 resident
            ],
            out_specs=pl.BlockSpec((tile_b, A_p), lambda i: (i, 0)),
        ),
        compiler_params=pltpu.CompilerParams(
            dimension_semantics=("parallel",),        # v7x: shard batch tiles over 2 TCs
            vmem_limit_bytes=_vmem_limit_bytes(),
        ),
    )(x_p, w1_p, b1_p, w2_p, b2_p)

    return q_p[:B, :action_size]


_SINGLE_BUFFER_OK = None  # memoized: does this jax version accept pl.Buffered(1)?


def qnetwork_forward(x, params, *, action_size, tile_b=256, out_dtype=jnp.float32):
    """Pallas implementation of QNetwork.forward(x) given pre-padded params."""
    global _SINGLE_BUFFER_OK
    if _SINGLE_BUFFER_OK is not False:
        try:
            out = _forward_impl(x, *params, action_size=action_size, tile_b=tile_b,
                                out_dtype=out_dtype, single_buffer_weights=True)
            _SINGLE_BUFFER_OK = True
            return out
        except Exception:
            _SINGLE_BUFFER_OK = False  # fall back to default double buffering
    return _forward_impl(x, *params, action_size=action_size, tile_b=tile_b,
                         out_dtype=out_dtype, single_buffer_weights=False)


class QNetworkPallas:
    """Module-like wrapper: pads/casts weights once, then runs the Pallas forward."""

    def __init__(self, w1, b1, w2, b2):
        self.action_size = int(w2.shape[1])
        self.params = prepare_qnetwork_params(w1, b1, w2, b2)

    def __call__(self, x, *, tile_b=256, out_dtype=jnp.float32):
        return qnetwork_forward(x, self.params, action_size=self.action_size,
                                tile_b=tile_b, out_dtype=out_dtype)


def make_params(key, state_size, feature_size, action_size):
    k1, k2, k3 = jax.random.split(key, 3)
    # featurise layer params (torch default init ~ U(-1/sqrt(fan_in), +1/sqrt(fan_in)))
    bound1 = 1.0 / jnp.sqrt(state_size)
    w1 = jax.random.uniform(k1, (state_size, feature_size), jnp.float32,
                            minval=-bound1, maxval=bound1)
    b1 = jax.random.uniform(k2, (1, feature_size), jnp.float32,
                            minval=-bound1, maxval=bound1)
    # q_fn.linear: weight zero-initialized (nn.init.zeros_), bias keeps default init
    w2 = jnp.zeros((feature_size, action_size), jnp.float32)
    bound2 = 1.0 / jnp.sqrt(feature_size)
    b2 = jax.random.uniform(k3, (1, action_size), jnp.float32,
                            minval=-bound2, maxval=bound2)
    return w1, b1, w2, b2


if __name__ == "__main__":
    state_size, feature_size, action_size = 32, 64, 8

    key = jax.random.PRNGKey(0)
    kx1, kx2, kp, kw2 = jax.random.split(key, 4)
    w1, b1, w2_zero, b2 = make_params(kp, state_size, feature_size, action_size)

    # --- Module-faithful forward: q_fn.linear.weight is zero-initialized. ---
    net = QNetworkPallas(w1, b1, w2_zero, b2)
    x = jax.random.normal(kx1, (40, state_size), jnp.float32)   # -> 2 batch tiles of 32
    q = net(x)
    jax.block_until_ready(q)
    q_ref = jnp.maximum(x @ w1 + b1, 0.0) @ w2_zero + b2
    assert q.shape == (40, action_size) and q.dtype == jnp.float32
    assert jnp.allclose(q, q_ref, atol=1e-5), "mismatch vs reference (zero W2)"

    # --- Nonzero W2 so the second matmul is exercised; odd small batch; bf16 output stream. ---
    bound2 = 1.0 / jnp.sqrt(feature_size)
    w2_rand = jax.random.uniform(kw2, (feature_size, action_size), jnp.float32,
                                 minval=-bound2, maxval=bound2)
    net2 = QNetworkPallas(w1, b1, w2_rand, b2)
    x2 = jax.random.normal(kx2, (7, state_size), jnp.float32)
    q2 = net2(x2, out_dtype=jnp.bfloat16).astype(jnp.float32)
    jax.block_until_ready(q2)
    q2_ref = jnp.maximum(x2 @ w1 + b1, 0.0) @ w2_rand + b2
    # bf16 MXU operands (f32 accumulation) + bf16 output store -> loose tolerance.
    assert q2.shape == (7, action_size)
    assert jnp.allclose(q2, q2_ref, atol=3e-2, rtol=3e-2), "mismatch vs reference (random W2)"

    print("KERNEL_OK")
</pallas_src>

<mosaic_0001>
module attributes {stable_mosaic.version = 11 : i64} {
  func.func @_qnet_kernel(%arg0: i32, %arg1: memref<32x128xbf16, #tpu.memory_space<vmem>>, %arg2: memref<128x128xbf16, #tpu.memory_space<vmem>>, %arg3: memref<1x128xf32, #tpu.memory_space<vmem>>, %arg4: memref<128x128xbf16, #tpu.memory_space<vmem>>, %arg5: memref<1x128xf32, #tpu.memory_space<vmem>>, %arg6: memref<32x128xf32, #tpu.memory_space<vmem>>) attributes {dimension_semantics = [#tpu.dimension_semantics<parallel>], iteration_bounds = array<i64: 2>, scalar_prefetch = 0 : i64, scratch_operands = 0 : i64, tpu.core_type = #tpu.core_type<tc>, window_params = [{transform_indices = @transform_0, window_bounds = array<i64: 32, 128>}, {pipeline_mode = #tpu.pipeline_mode<synchronous>, transform_indices = @transform_1, window_bounds = array<i64: 128, 128>}, {pipeline_mode = #tpu.pipeline_mode<synchronous>, transform_indices = @transform_2, window_bounds = array<i64: 1, 128>}, {pipeline_mode = #tpu.pipeline_mode<synchronous>, transform_indices = @transform_3, window_bounds = array<i64: 128, 128>}, {pipeline_mode = #tpu.pipeline_mode<synchronous>, transform_indices = @transform_4, window_bounds = array<i64: 1, 128>}, {transform_indices = @transform_5, window_bounds = array<i64: 32, 128>}]} {
    %c0 = arith.constant 0 : index
    %c0_0 = arith.constant 0 : index
    %0 = vector.load %arg1[%c0, %c0_0] : memref<32x128xbf16, #tpu.memory_space<vmem>>, vector<32x128xbf16>
    %c0_1 = arith.constant 0 : index
    %c0_2 = arith.constant 0 : index
    %1 = vector.load %arg2[%c0_1, %c0_2] : memref<128x128xbf16, #tpu.memory_space<vmem>>, vector<128x128xbf16>
    %cst = arith.constant dense<0.000000e+00> : vector<32x128xf32>
    %2 = tpu.matmul %0, %1, %cst {dimension_numbers = #tpu.dot_dimension_numbers<[1], [0], [0], [1], [0, 0, 1, 1], [], []>} : vector<32x128xbf16>, vector<128x128xbf16>, vector<32x128xf32> -> vector<32x128xf32>
    %c0_3 = arith.constant 0 : index
    %c0_4 = arith.constant 0 : index
    %3 = vector.load %arg3[%c0_3, %c0_4] : memref<1x128xf32, #tpu.memory_space<vmem>>, vector<1x128xf32>
    %4 = vector.broadcast %3 : vector<1x128xf32> to vector<32x128xf32>
    %5 = arith.addf %2, %4 : vector<32x128xf32>
    %cst_5 = arith.constant 0.000000e+00 : f32
    %6 = vector.broadcast %cst_5 : f32 to vector<32x128xf32>
    %7 = arith.maximumf %5, %6 : vector<32x128xf32>
    %8 = arith.truncf %7 : vector<32x128xf32> to vector<32x128xbf16>
    %c0_6 = arith.constant 0 : index
    %c0_7 = arith.constant 0 : index
    %9 = vector.load %arg4[%c0_6, %c0_7] : memref<128x128xbf16, #tpu.memory_space<vmem>>, vector<128x128xbf16>
    %cst_8 = arith.constant dense<0.000000e+00> : vector<32x128xf32>
    %10 = tpu.matmul %8, %9, %cst_8 {dimension_numbers = #tpu.dot_dimension_numbers<[1], [0], [0], [1], [0, 0, 1, 1], [], []>} : vector<32x128xbf16>, vector<128x128xbf16>, vector<32x128xf32> -> vector<32x128xf32>
    %c0_9 = arith.constant 0 : index
    %c0_10 = arith.constant 0 : index
    %11 = vector.load %arg5[%c0_9, %c0_10] : memref<1x128xf32, #tpu.memory_space<vmem>>, vector<1x128xf32>
    %12 = vector.broadcast %11 : vector<1x128xf32> to vector<32x128xf32>
    %13 = arith.addf %10, %12 : vector<32x128xf32>
    %c0_11 = arith.constant 0 : index
    %c0_12 = arith.constant 0 : index
    %14 = vector.load %arg6[%c0_11, %c0_12] : memref<32x128xf32, #tpu.memory_space<vmem>>, vector<32x128xf32>
    tpu.vector_store %arg6[%c0_11, %c0_12], %13 {strides = array<i32>} : memref<32x128xf32, #tpu.memory_space<vmem>>, vector<32x128xf32>,
    return
  }
  func.func @transform_0(%arg0: i32) -> (i32, i32) {
    %c0_i32 = arith.constant 0 : i32
    %c0_i32_0 = arith.constant 0 : i32
    return %arg0, %c0_i32 : i32, i32
  }
  func.func @transform_1(%arg0: i32) -> (i32, i32) {
    %c0_i32 = arith.constant 0 : i32
    %c0_i32_0 = arith.constant 0 : i32
    %c0_i32_1 = arith.constant 0 : i32
    return %c0_i32, %c0_i32_0 : i32, i32
  }
  func.func @transform_2(%arg0: i32) -> (i32, i32) {
    %c0_i32 = arith.constant 0 : i32
    %c0_i32_0 = arith.constant 0 : i32
    %c0_i32_1 = arith.constant 0 : i32
    return %c0_i32, %c0_i32_0 : i32, i32
  }
  func.func @transform_3(%arg0: i32) -> (i32, i32) {
    %c0_i32 = arith.constant 0 : i32
    %c0_i32_0 = arith.constant 0 : i32
    %c0_i32_1 = arith.constant 0 : i32
    return %c0_i32, %c0_i32_0 : i32, i32
  }
  func.func @transform_4(%arg0: i32) -> (i32, i32) {
    %c0_i32 = arith.constant 0 : i32
    %c0_i32_0 = arith.constant 0 : i32
    %c0_i32_1 = arith.constant 0 : i32
    return %c0_i32, %c0_i32_0 : i32, i32
  }
  func.func @transform_5(%arg0: i32) -> (i32, i32) {
    %c0_i32 = arith.constant 0 : i32
    %c0_i32_0 = arith.constant 0 : i32
    return %arg0, %c0_i32 : i32, i32
  }
}

module attributes {stable_mosaic.version = 11 : i64} {
  func.func @_qnet_kernel(%arg0: i32, %arg1: memref<32x128xbf16, #tpu.memory_space<vmem>>, %arg2: memref<128x128xbf16, #tpu.memory_space<vmem>>, %arg3: memref<1x128xf32, #tpu.memory_space<vmem>>, %arg4: memref<128x128xbf16, #tpu.memory_space<vmem>>, %arg5: memref<1x128xf32, #tpu.memory_space<vmem>>, %arg6: memref<32x128xf32, #tpu.memory_space<vmem>>) attributes {dimension_semantics = [#tpu.dimension_semantics<parallel>], iteration_bounds = array<i64: 2>, scalar_prefetch = 0 : i64, scratch_operands = 0 : i64, tpu.core_type = #tpu.core_type<tc>, window_params = [{transform_indices = @transform_0, window_bounds = array<i64: 32, 128>}, {pipeline_mode = #tpu.pipeline_mode<synchronous>, transform_indices = @transform_1, window_bounds = array<i64: 128, 128>}, {pipeline_mode = #tpu.pipeline_mode<synchronous>, transform_indices = @transform_2, window_bounds = array<i64: 1, 128>}, {pipeline_mode = #tpu.pipeline_mode<synchronous>, transform_indices = @transform_3, window_bounds = array<i64: 128, 128>}, {pipeline_mode = #tpu.pipeline_mode<synchronous>, transform_indices = @transform_4, window_bounds = array<i64: 1, 128>}, {transform_indices = @transform_5, window_bounds = array<i64: 32, 128>}]} {
    %c0 = arith.constant 0 : index
    %c0_0 = arith.constant 0 : index
    %0 = vector.load %arg1[%c0, %c0_0] : memref<32x128xbf16, #tpu.memory_space<vmem>>, vector<32x128xbf16>
    %c0_1 = arith.constant 0 : index
    %c0_2 = arith.constant 0 : index
    %1 = vector.load %arg2[%c0_1, %c0_2] : memref<128x128xbf16, #tpu.memory_space<vmem>>, vector<128x128xbf16>
    %cst = arith.constant dense<0.000000e+00> : vector<32x128xf32>
    %2 = tpu.matmul %0, %1, %cst {dimension_numbers = #tpu.dot_dimension_numbers<[1], [0], [0], [1], [0, 0, 1, 1], [], []>} : vector<32x128xbf16>, vector<128x128xbf16>, vector<32x128xf32> -> vector<32x128xf32>
    %c0_3 = arith.constant 0 : index
    %c0_4 = arith.constant 0 : index
    %3 = vector.load %arg3[%c0_3, %c0_4] : memref<1x128xf32, #tpu.memory_space<vmem>>, vector<1x128xf32>
    %4 = vector.broadcast %3 : vector<1x128xf32> to vector<32x128xf32>
    %5 = arith.addf %2, %4 : vector<32x128xf32>
    %cst_5 = arith.constant 0.000000e+00 : f32
    %6 = vector.broadcast %cst_5 : f32 to vector<32x128xf32>
    %7 = arith.maximumf %5, %6 : vector<32x128xf32>
    %8 = arith.truncf %7 : vector<32x128xf32> to vector<32x128xbf16>
    %c0_6 = arith.constant 0 : index
    %c0_7 = arith.constant 0 : index
    %9 = vector.load %arg4[%c0_6, %c0_7] : memref<128x128xbf16, #tpu.memory_space<vmem>>, vector<128x128xbf16>
    %cst_8 = arith.constant dense<0.000000e+00> : vector<32x128xf32>
    %10 = tpu.matmul %8, %9, %cst_8 {dimension_numbers = #tpu.dot_dimension_numbers<[1], [0], [0], [1], [0, 0, 1, 1], [], []>} : vector<32x128xbf16>, vector<128x128xbf16>, vector<32x128xf32> -> vector<32x128xf32>
    %c0_9 = arith.constant 0 : index
    %c0_10 = arith.constant 0 : index
    %11 = vector.load %arg5[%c0_9, %c0_10] : memref<1x128xf32, #tpu.memory_space<vmem>>, vector<1x128xf32>
    %12 = vector.broadcast %11 : vector<1x128xf32> to vector<32x128xf32>
    %13 = arith.addf %10, %12 : vector<32x128xf32>
    %c0_11 = arith.constant 0 : index
    %c0_12 = arith.constant 0 : index
    %14 = vector.load %arg6[%c0_11, %c0_12] : memref<32x128xf32, #tpu.memory_space<vmem>>, vector<32x128xf32>
    tpu.vector_store %arg6[%c0_11, %c0_12], %13 {strides = array<i32>} : memref<32x128xf32, #tpu.memory_space<vmem>>, vector<32x128xf32>,
    return
  }
  func.func @transform_0(%arg0: i32) -> (i32, i32) {
    %c0_i32 = arith.constant 0 : i32
    %c0_i32_0 = arith.constant 0 : i32
    return %arg0, %c0_i32 : i32, i32
  }
  func.func @transform_1(%arg0: i32) -> (i32, i32) {
    %c0_i32 = arith.constant 0 : i32
    %c0_i32_0 = arith.constant 0 : i32
    %c0_i32_1 = arith.constant 0 : i32
    return %c0_i32, %c0_i32_0 : i32, i32
  }
  func.func @transform_2(%arg0: i32) -> (i32, i32) {
    %c0_i32 = arith.constant 0 : i32
    %c0_i32_0 = arith.constant 0 : i32
    %c0_i32_1 = arith.constant 0 : i32
    return %c0_i32, %c0_i32_0 : i32, i32
  }
  func.func @transform_3(%arg0: i32) -> (i32, i32) {
    %c0_i32 = arith.constant 0 : i32
    %c0_i32_0 = arith.constant 0 : i32
    %c0_i32_1 = arith.constant 0 : i32
    return %c0_i32, %c0_i32_0 : i32, i32
  }
  func.func @transform_4(%arg0: i32) -> (i32, i32) {
    %c0_i32 = arith.constant 0 : i32
    %c0_i32_0 = arith.constant 0 : i32
    %c0_i32_1 = arith.constant 0 : i32
    return %c0_i32, %c0_i32_0 : i32, i32
  }
  func.func @transform_5(%arg0: i32) -> (i32, i32) {
    %c0_i32 = arith.constant 0 : i32
    %c0_i32_0 = arith.constant 0 : i32
    return %arg0, %c0_i32 : i32, i32
  }
}

</mosaic_0001>

<bundles_post_ra>
// kernel: _forward_impl.1
= control target key start
LH: loop header
LB: loop body
LE: loop exit
PB: predicated region body
PF: predicated region fallthrough
CT: control target
= control target key end

     0   :  { %s706_s18 = smov 0   ;;  %s785_s0 = inlined_call_operand.vmem [shape: bf16[64,128], index: 0, kind: input, shape index: {}]   ;;  %s786_s1 = inlined_call_operand.vmem [shape: bf16[128,128], index: 1, kind: input, shape index: {}]   ;;  %s787_s2 = inlined_call_operand.vmem [shape: f32[1,128], index: 2, kind: input, shape index: {}]   ;;  %s788_s3 = inlined_call_operand.vmem [shape: bf16[128,128], index: 3, kind: input, shape index: {}]   ;;  %s789_s4 = inlined_call_operand.vmem [shape: f32[1,128], index: 4, kind: input, shape index: {}]   ;;  %s790_s5 = inlined_call_operand.vmem [shape: f32[64,128], index: 5, kind: output, shape index: {}]  }
   0x1 LB: > { %s551_s19 = sadd.s32 4294967295, %s674_s18   ;;  %p555_p0 = scmp.ge.s32.totalorder %s674_s18, 1  ;;  %s674_s18 = sphi %s706_s18, %s15_s18  }
   0x2   : > { %p188_p1 = scmp.lt.s32.totalorder %s674_s18, 3 }
   0x4   : > { %p189_p2 = pnand %p555_p0, %p188_p1 }
   0x5   : > { %s556_s22 = sshll.u32 (!%p189_p2), %s551_s19, 2 }
   0x6   : > { %192 = sbr.rel (%p189_p2) target bundleno = 452 (0x1c4), region = 40  ;;  %p217_p3 = scmp.lt.s32.totalorder (!%p189_p2), %s556_s22, 7 }
   0xb   : > { %v650_v0 = vld [vmem:[%s786_s1 + $0x38] sm:$0xff]   ;;  %v651_v1 = vld [vmem:[%s786_s1 + $0x30] sm:$0xff]   ;;  %s792_s22 = smov (!%p217_p3, %s556_s22), 7  ;;  %v652_v2 = vld [vmem:[%s786_s1 + $0x28] sm:$0xff]  }
   0xc   : > { %602 = vmatprep.subr.bf16.mxu0 %v650_v0  ;;  %s557_s27 = sshll.u32 %s792_s22, 2  ;;  %v653_v3 = vld [vmem:[%s786_s1 + $0x20] sm:$0xff]   ;;  %v660_v5 = vld [vmem:[%s788_s3 + $0x38] sm:$0xff]   ;;  %v661_v6 = vld [vmem:[%s788_s3 + $0x30] sm:$0xff]   ;;  %s559_s11 = sshll.u32 %s792_s22, 3 }
   0xd   : > { %603 = vmatpush3.bf16.msra.mxu0 %v650_v0  ;;  %s729_s30 = scalar_lea.vmem %s785_s0, %s557_s27  ;;  %v654_v7 = vld [vmem:[%s786_s1 + $0x18] sm:$0xff]   ;;  %622 = vmatprep.subr.bf16.mxu1 %v660_v5  ;;  %v655_v8 = vld [vmem:[%s786_s1 + $0x10] sm:$0xff]   ;;  %v662_v9 = vld [vmem:[%s788_s3 + $0x28] sm:$0xff]   ;;  %s226_s16 = scalar_lea.vmem %s790_s5, %s559_s11 }
   0xe   : > { %604 = vmatprep.subr.bf16.mxu0 %v651_v1  ;;  %v658_v4 = vld [vmem:[%s729_s30] sm:$0xff]   ;;  %623 = vmatpush3.bf16.msra.mxu1 %v660_v5  ;;  %v656_v11 = vld [vmem:[%s786_s1 + $0x8] sm:$0xff]   ;;  %v664_v12 = vld [vmem:[%s788_s3 + $0x18] sm:$0xff]  }
   0xf   : > { %618 = vmatprep.mubr.bf16.mxu0 %v658_v4  ;;  %624 = vmatprep.subr.bf16.mxu1 %v661_v6  ;;  %v663_v10 = vld [vmem:[%s788_s3 + $0x20] sm:$0xff]   ;;  %v659_v14 = vld [vmem:[%s729_s30 + $0x8] sm:$0xff]   ;;  %v665_v15 = vld [vmem:[%s788_s3 + $0x10] sm:$0xff]  }
  0x10   : > { %v657_v13 = vld [vmem:[%s786_s1] sm:$0xff]   ;;  %v666_v16 = vld [vmem:[%s788_s3 + $0x8] sm:$0xff]  }
  0x11   : > { %605 = vmatpush3.bf16.msra.mxu0 %v651_v1  ;;  %v667_v17 = vld [vmem:[%s788_s3] sm:$0xff]  }
  0x12   : > { %606 = vmatprep.subr.bf16.mxu0 %v652_v2  ;;  %625 = vmatpush3.bf16.msra.mxu1 %v661_v6  ;;  %v560_v20 = vld [vmem:[%s787_s2] ss:$0 sm:$0xff] }
  0x13   : > { %626 = vmatprep.subr.bf16.mxu1 %v662_v9  ;;  %v571_v34 = vld [vmem:[%s789_s4] ss:$0 sm:$0xff] }
  0x15   : > { %607 = vmatpush3.bf16.msra.mxu0 %v652_v2 }
  0x16   : > { %608 = vmatprep.subr.bf16.mxu0 %v653_v3  ;;  %627 = vmatpush3.bf16.msra.mxu1 %v662_v9 }
  0x17   : > { %628 = vmatprep.subr.bf16.mxu1 %v663_v10 }
  0x19   : > { %609 = vmatpush3.bf16.msra.mxu0 %v653_v3 }
  0x1a   : > { %610 = vmatprep.subr.bf16.mxu0 %v654_v7  ;;  %629 = vmatpush3.bf16.msra.mxu1 %v663_v10 }
  0x1b   : > { %630 = vmatprep.subr.bf16.mxu1 %v664_v12 }
  0x1d   : > { %611 = vmatpush3.bf16.msra.mxu0 %v654_v7 }
  0x1e   : > { %612 = vmatprep.subr.bf16.mxu0 %v655_v8  ;;  %631 = vmatpush3.bf16.msra.mxu1 %v664_v12 }
  0x1f   : > { %632 = vmatprep.subr.bf16.mxu1 %v665_v15 }
  0x21   : > { %613 = vmatpush3.bf16.msra.mxu0 %v655_v8 }
  0x22   : > { %614 = vmatprep.subr.bf16.mxu0 %v656_v11  ;;  %633 = vmatpush3.bf16.msra.mxu1 %v665_v15 }
  0x23   : > { %634 = vmatprep.subr.bf16.mxu1 %v666_v16 }
  0x25   : > { %615 = vmatpush3.bf16.msra.mxu0 %v656_v11 }
  0x26   : > { %616 = vmatprep.subr.bf16.mxu0 %v657_v13  ;;  %635 = vmatpush3.bf16.msra.mxu1 %v666_v16 }
  0x27   : > { %636 = vmatprep.subr.bf16.mxu1 %v667_v17 }
  0x29   : > { %617 = vmatpush3.bf16.msra.mxu0 %v657_v13 }
  0x2a   : > { %637 = vmatpush3.bf16.msra.mxu1 %v667_v17 }
  0x2c   : > { %619 = vmatmul.mubr.bf16.vlgmr.msra.gmra.mxu0 %v659_v14 }
  0xec   : > { %v620_v18 = vpop.f32.mrf.mxu0 }
  0xed   : > { %v359_v24 = vadd.f32 %v620_v18, %v560_v20 }
  0xee   : > { %v350_v19 = vpop.f32.mrf.mxu0 }
  0xef   : > { %v351_v22 = vadd.f32 %v560_v20, %v350_v19  ;;  %v367_v30 = vmax.f32 %v359_v24, 0.0 }
  0xf0   : > { %v621_v21 = vpop.f32.mrf.mxu0 }
  0xf1   : > { %v362_v23 = vadd.f32 %v621_v21, %v560_v20  ;;  %v365_v28 = vmax.f32 %v351_v22, 0.0 }
  0xf2   : > { %v353_v25 = vpop.f32.mrf.mxu0 }
  0xf3   : > { %v354_v26 = vadd.f32 %v560_v20, %v353_v25  ;;  %v368_v27 = vmax.f32 %v362_v23, 0.0 }
  0xf5   : > { %v366_v29 = vmax.f32 %v354_v26, 0.0  ;;  %v370_v32 = vpack.c.bf16 %v368_v27, %v367_v30 }
  0xf7   : > { %v369_v31 = vpack.c.bf16 %v366_v29, %v365_v28 }
  0xf9   : > { %638 = vmatprep.mubr.bf16.mxu1 %v369_v31 }
  0xfa   : > { %639 = vmatmul.mubr.bf16.vlgmr.msra.gmra.mxu1 %v370_v32 }
 0x1ba   : > { %v640_v33 = vpop.f32.mrf.mxu1 }
 0x1bb   : > { %v485_v40 = vadd.f32 %v640_v33, %v571_v34 }
 0x1bc   : > { %v476_v35 = vpop.f32.mrf.mxu1 }
 0x1bd   : > { %v477_v36 = vadd.f32 %v571_v34, %v476_v35  ;;  %493 = vst [vmem:[%s226_s16 + $0x10] sm:$0xff] %v485_v40 }
 0x1be   : > { %v641_v37 = vpop.f32.mrf.mxu1 }
 0x1bf   : > { %491 = vst [vmem:[%s226_s16] sm:$0xff] %v477_v36  ;;  %v488_v41 = vadd.f32 %v641_v37, %v571_v34 }
 0x1c0   : > { %v479_v38 = vpop.f32.mrf.mxu1 }
 0x1c1   : > { %v480_v39 = vadd.f32 %v571_v34, %v479_v38  ;;  %494 = vst [vmem:[%s226_s16 + $0x18] sm:$0xff] %v488_v41 }
 0x1c3   : > { %492 = vst [vmem:[%s226_s16 + $0x8] sm:$0xff] %v480_v39 }
 0x1c4 PF: > { %s15_s18 = sadd.s32 1, %s674_s18  }
 0x1c5   : > { %p12_p4 = scmp.ge.s32.totalorder %s15_s18, 4  }
 0x1c7   :  { %14 = sbr.rel (!%p12_p4) target bundleno = 1 (0x1), region = 70 }

// kernel: _forward_impl.1
= control target key start
LH: loop header
LB: loop body
LE: loop exit
PB: predicated region body
PF: predicated region fallthrough
CT: control target
= control target key end

     0   :  { %s706_s18 = smov 0   ;;  %s785_s0 = inlined_call_operand.vmem [shape: bf16[64,128], index: 0, kind: input, shape index: {}]   ;;  %s786_s1 = inlined_call_operand.vmem [shape: bf16[128,128], index: 1, kind: input, shape index: {}]   ;;  %s787_s2 = inlined_call_operand.vmem [shape: f32[1,128], index: 2, kind: input, shape index: {}]   ;;  %s788_s3 = inlined_call_operand.vmem [shape: bf16[128,128], index: 3, kind: input, shape index: {}]   ;;  %s789_s4 = inlined_call_operand.vmem [shape: f32[1,128], index: 4, kind: input, shape index: {}]   ;;  %s790_s5 = inlined_call_operand.vmem [shape: f32[64,128], index: 5, kind: output, shape index: {}]  }
   0x1 LB: > { %s551_s19 = sadd.s32 4294967295, %s674_s18   ;;  %p555_p0 = scmp.ge.s32.totalorder %s674_s18, 1  ;;  %s674_s18 = sphi %s706_s18, %s15_s18  }
   0x2   : > { %p188_p1 = scmp.lt.s32.totalorder %s674_s18, 3 }
   0x4   : > { %p189_p2 = pnand %p555_p0, %p188_p1 }
   0x5   : > { %s556_s22 = sshll.u32 (!%p189_p2), %s551_s19, 2 }
   0x6   : > { %192 = sbr.rel (%p189_p2) target bundleno = 452 (0x1c4), region = 40  ;;  %p217_p3 = scmp.lt.s32.totalorder (!%p189_p2), %s556_s22, 7 }
   0xb   : > { %v650_v0 = vld [vmem:[%s786_s1 + $0x38] sm:$0xff]   ;;  %v651_v1 = vld [vmem:[%s786_s1 + $0x30] sm:$0xff]   ;;  %s792_s22 = smov (!%p217_p3, %s556_s22), 7  ;;  %v652_v2 = vld [vmem:[%s786_s1 + $0x28] sm:$0xff]  }
   0xc   : > { %602 = vmatprep.subr.bf16.mxu0 %v650_v0  ;;  %s557_s27 = sshll.u32 %s792_s22, 2  ;;  %v653_v3 = vld [vmem:[%s786_s1 + $0x20] sm:$0xff]   ;;  %v660_v5 = vld [vmem:[%s788_s3 + $0x38] sm:$0xff]   ;;  %v661_v6 = vld [vmem:[%s788_s3 + $0x30] sm:$0xff]   ;;  %s559_s11 = sshll.u32 %s792_s22, 3 }
   0xd   : > { %603 = vmatpush3.bf16.msra.mxu0 %v650_v0  ;;  %s729_s30 = scalar_lea.vmem %s785_s0, %s557_s27  ;;  %v654_v7 = vld [vmem:[%s786_s1 + $0x18] sm:$0xff]   ;;  %622 = vmatprep.subr.bf16.mxu1 %v660_v5  ;;  %v655_v8 = vld [vmem:[%s786_s1 + $0x10] sm:$0xff]   ;;  %v662_v9 = vld [vmem:[%s788_s3 + $0x28] sm:$0xff]   ;;  %s226_s16 = scalar_lea.vmem %s790_s5, %s559_s11 }
   0xe   : > { %604 = vmatprep.subr.bf16.mxu0 %v651_v1  ;;  %v658_v4 = vld [vmem:[%s729_s30] sm:$0xff]   ;;  %623 = vmatpush3.bf16.msra.mxu1 %v660_v5  ;;  %v656_v11 = vld [vmem:[%s786_s1 + $0x8] sm:$0xff]   ;;  %v664_v12 = vld [vmem:[%s788_s3 + $0x18] sm:$0xff]  }
   0xf   : > { %618 = vmatprep.mubr.bf16.mxu0 %v658_v4  ;;  %624 = vmatprep.subr.bf16.mxu1 %v661_v6  ;;  %v663_v10 = vld [vmem:[%s788_s3 + $0x20] sm:$0xff]   ;;  %v659_v14 = vld [vmem:[%s729_s30 + $0x8] sm:$0xff]   ;;  %v665_v15 = vld [vmem:[%s788_s3 + $0x10] sm:$0xff]  }
  0x10   : > { %v657_v13 = vld [vmem:[%s786_s1] sm:$0xff]   ;;  %v666_v16 = vld [vmem:[%s788_s3 + $0x8] sm:$0xff]  }
  0x11   : > { %605 = vmatpush3.bf16.msra.mxu0 %v651_v1  ;;  %v667_v17 = vld [vmem:[%s788_s3] sm:$0xff]  }
  0x12   : > { %606 = vmatprep.subr.bf16.mxu0 %v652_v2  ;;  %625 = vmatpush3.bf16.msra.mxu1 %v661_v6  ;;  %v560_v20 = vld [vmem:[%s787_s2] ss:$0 sm:$0xff] }
  0x13   : > { %626 = vmatprep.subr.bf16.mxu1 %v662_v9  ;;  %v571_v34 = vld [vmem:[%s789_s4] ss:$0 sm:$0xff] }
  0x15   : > { %607 = vmatpush3.bf16.msra.mxu0 %v652_v2 }
  0x16   : > { %608 = vmatprep.subr.bf16.mxu0 %v653_v3  ;;  %627 = vmatpush3.bf16.msra.mxu1 %v662_v9 }
  0x17   : > { %628 = vmatprep.subr.bf16.mxu1 %v663_v10 }
  0x19   : > { %609 = vmatpush3.bf16.msra.mxu0 %v653_v3 }
  0x1a   : > { %610 = vmatprep.subr.bf16.mxu0 %v654_v7  ;;  %629 = vmatpush3.bf16.msra.mxu1 %v663_v10 }
  0x1b   : > { %630 = vmatprep.subr.bf16.mxu1 %v664_v12 }
  0x1d   : > { %611 = vmatpush3.bf16.msra.mxu0 %v654_v7 }
  0x1e   : > { %612 = vmatprep.subr.bf16.mxu0 %v655_v8  ;;  %631 = vmatpush3.bf16.msra.mxu1 %v664_v12 }
  0x1f   : > { %632 = vmatprep.subr.bf16.mxu1 %v665_v15 }
  0x21   : > { %613 = vmatpush3.bf16.msra.mxu0 %v655_v8 }
  0x22   : > { %614 = vmatprep.subr.bf16.mxu0 %v656_v11  ;;  %633 = vmatpush3.bf16.msra.mxu1 %v665_v15 }
  0x23   : > { %634 = vmatprep.subr.bf16.mxu1 %v666_v16 }
  0x25   : > { %615 = vmatpush3.bf16.msra.mxu0 %v656_v11 }
  0x26   : > { %616 = vmatprep.subr.bf16.mxu0 %v657_v13  ;;  %635 = vmatpush3.bf16.msra.mxu1 %v666_v16 }
  0x27   : > { %636 = vmatprep.subr.bf16.mxu1 %v667_v17 }
  0x29   : > { %617 = vmatpush3.bf16.msra.mxu0 %v657_v13 }
  0x2a   : > { %637 = vmatpush3.bf16.msra.mxu1 %v667_v17 }
  0x2c   : > { %619 = vmatmul.mubr.bf16.vlgmr.msra.gmra.mxu0 %v659_v14 }
  0xec   : > { %v620_v18 = vpop.f32.mrf.mxu0 }
  0xed   : > { %v359_v24 = vadd.f32 %v620_v18, %v560_v20 }
  0xee   : > { %v350_v19 = vpop.f32.mrf.mxu0 }
  0xef   : > { %v351_v22 = vadd.f32 %v560_v20, %v350_v19  ;;  %v367_v30 = vmax.f32 %v359_v24, 0.0 }
  0xf0   : > { %v621_v21 = vpop.f32.mrf.mxu0 }
  0xf1   : > { %v362_v23 = vadd.f32 %v621_v21, %v560_v20  ;;  %v365_v28 = vmax.f32 %v351_v22, 0.0 }
  0xf2   : > { %v353_v25 = vpop.f32.mrf.mxu0 }
  0xf3   : > { %v354_v26 = vadd.f32 %v560_v20, %v353_v25  ;;  %v368_v27 = vmax.f32 %v362_v23, 0.0 }
  0xf5   : > { %v366_v29 = vmax.f32 %v354_v26, 0.0  ;;  %v370_v32 = vpack.c.bf16 %v368_v27, %v367_v30 }
  0xf7   : > { %v369_v31 = vpack.c.bf16 %v366_v29, %v365_v28 }
  0xf9   : > { %638 = vmatprep.mubr.bf16.mxu1 %v369_v31 }
  0xfa   : > { %639 = vmatmul.mubr.bf16.vlgmr.msra.gmra.mxu1 %v370_v32 }
 0x1ba   : > { %v640_v33 = vpop.f32.mrf.mxu1 }
 0x1bb   : > { %v485_v40 = vadd.f32 %v640_v33, %v571_v34 }
 0x1bc   : > { %v476_v35 = vpop.f32.mrf.mxu1 }
 0x1bd   : > { %v477_v36 = vadd.f32 %v571_v34, %v476_v35  ;;  %493 = vst [vmem:[%s226_s16 + $0x10] sm:$0xff] %v485_v40 }
 0x1be   : > { %v641_v37 = vpop.f32.mrf.mxu1 }
 0x1bf   : > { %491 = vst [vmem:[%s226_s16] sm:$0xff] %v477_v36  ;;  %v488_v41 = vadd.f32 %v641_v37, %v571_v34 }
 0x1c0   : > { %v479_v38 = vpop.f32.mrf.mxu1 }
 0x1c1   : > { %v480_v39 = vadd.f32 %v571_v34, %v479_v38  ;;  %494 = vst [vmem:[%s226_s16 + $0x18] sm:$0xff] %v488_v41 }
 0x1c3   : > { %492 = vst [vmem:[%s226_s16 + $0x8] sm:$0xff] %v480_v39 }
 0x1c4 PF: > { %s15_s18 = sadd.s32 1, %s674_s18  }
 0x1c5   : > { %p12_p4 = scmp.ge.s32.totalorder %s15_s18, 4  }
 0x1c7   :  { %14 = sbr.rel (!%p12_p4) target bundleno = 1 (0x1), region = 70 }

</bundles_post_ra>
